<compile_context>
chip_gen: v7x
topology: tpu7x:2x2x1
jax: 0.10.0
libtpu: 0.0.40
codegen_flags: <defaults>
</compile_context>

<pallas_src>
import jax
import jax.numpy as jnp
from jax.experimental import pallas as pl
from jax.experimental.pallas import tpu as pltpu


def _img_to_vector_kernel(x_ref, o_ref):
    # x_ref: (tm, tl) tile of the flattened (N*C, H*W) input, column-block 0.
    # Flattened element [:, 0] of each row is exactly x[n, c, 0, 0].
    o_ref[...] = x_ref[:, 0:1]


def img_to_vector_view(x):
    """Pallas implementation of ImgtoVectorView: returns x[:, :, 0, 0]."""
    assert x.ndim == 4, "ImgtoVectorView expects a 4-D (N, C, H, W) tensor"
    N, C, H, W = x.shape
    M, L = N * C, H * W

    # Contiguous collapse — pure metadata reshape, no HBM data movement.
    xr = x.reshape(M, L)

    # Row tile: full M when small (always satisfies the (8,128) rule since the
    # block equals the full dim), otherwise 512 (multiple of 8).
    tm = M if M <= 1024 else 512
    # Column tile: the index_map pins column-block 0, so only min(L, 128)
    # elements per row are ever DMA'd from HBM.
    tl = L if L < 128 else 128

    out = pl.pallas_call(
        _img_to_vector_kernel,
        out_shape=jax.ShapeDtypeStruct((M, 1), x.dtype),
        grid=(pl.cdiv(M, tm),),
        in_specs=[pl.BlockSpec((tm, tl), lambda i: (i, 0))],
        out_specs=pl.BlockSpec((tm, 1), lambda i: (i, 0)),
        compiler_params=pltpu.CompilerParams(
            dimension_semantics=("parallel",)),
    )(xr)
    # (N*C, 1) -> (N, C); trivial wrapper-side reshape of N*C scalars.
    return out.reshape(N, C)


if __name__ == "__main__":
    key = jax.random.PRNGKey(0)
    x = jax.random.normal(key, (2, 4, 16, 16), jnp.float32)   # NCHW

    out = jax.block_until_ready(img_to_vector_view(x))

    assert out.shape == (2, 4)
    ref = x[:, :, 0, 0]
    assert bool(jnp.array_equal(out, ref))
    assert bool(jnp.all(jnp.isfinite(out)))
    print("KERNEL_OK")
</pallas_src>

<mosaic_0001>
module attributes {stable_mosaic.version = 11 : i64} {
  func.func @_img_to_vector_kernel(%arg0: i32, %arg1: memref<8x128xf32, #tpu.memory_space<vmem>>, %arg2: memref<8x1xf32, #tpu.memory_space<vmem>>) attributes {dimension_semantics = [#tpu.dimension_semantics<parallel>], iteration_bounds = array<i64: 1>, scalar_prefetch = 0 : i64, scratch_operands = 0 : i64, tpu.core_type = #tpu.core_type<tc>, window_params = [{transform_indices = @transform_0, window_bounds = array<i64: 8, 128>}, {transform_indices = @transform_1, window_bounds = array<i64: 8, 1>}]} {
    %c0 = arith.constant 0 : index
    %c0_0 = arith.constant 0 : index
    %0 = vector.load %arg1[%c0, %c0_0] : memref<8x128xf32, #tpu.memory_space<vmem>>, vector<8x1xf32>
    %c0_1 = arith.constant 0 : index
    %c0_2 = arith.constant 0 : index
    %1 = vector.load %arg2[%c0_1, %c0_2] : memref<8x1xf32, #tpu.memory_space<vmem>>, vector<8x1xf32>
    tpu.vector_store %arg2[%c0_1, %c0_2], %0 {strides = array<i32>} : memref<8x1xf32, #tpu.memory_space<vmem>>, vector<8x1xf32>,
    return
  }
  func.func @transform_0(%arg0: i32) -> (i32, i32) {
    %c0_i32 = arith.constant 0 : i32
    %c0_i32_0 = arith.constant 0 : i32
    return %arg0, %c0_i32 : i32, i32
  }
  func.func @transform_1(%arg0: i32) -> (i32, i32) {
    %c0_i32 = arith.constant 0 : i32
    %c0_i32_0 = arith.constant 0 : i32
    return %arg0, %c0_i32 : i32, i32
  }
}

</mosaic_0001>

<bundles_post_ra>
// kernel: tpu_custom_call.1
= control target key start
LH: loop header
LB: loop body
LE: loop exit
PB: predicated region body
PF: predicated region fallthrough
CT: control target
= control target key end

     0   :  { %6 = vsyncpa [#allocation3], 0  ;;  %s53_s6 = smov [#allocation2]   ;;  %s82_s0 = inlined_call_operand.hbm [shape: f32[8,256], index: 0, kind: input, shape index: {}]   ;;  %s83_s1 = inlined_call_operand.vmem [shape: f32[8,1], index: 1, kind: output, shape index: {}]  }
   0x1   :  { %s13_s7 = sshll.u32 %s53_s6, 4  ;;  %s29_s10 = scalar_lea.hbm %s82_s0, 128  ;;  %s14_s7 = int_to_ptr.vmem [resolvable:$true] %s13_s7 }
   0x2   :  { %p30_p0 = scmp.ne.s32.totalorder %s82_s0, %s29_s10  ;;  %s31_s15 = scalar_lea.hbm %s82_s0, 256 }
   0x3   :  { %p32_p1 = scmp.lt.u32.totalorder %s31_s15, %s29_s10  ;;  %p33_p2 = scmp.lt.u32.totalorder %s29_s10, %s82_s0 }
   0x5   :  { %p34_p3 = por %p33_p2, %p32_p1 }
   0x7   :  { %p35_p4 = pnand %p34_p3, %p30_p0 }
   0x9   :  { %38 = shalt.err (!%p35_p4)
}
   0xa   :  { %s39_s18 = scalar_lea.vmem %s14_s7, 128  ;;  %p44_p6 = scmp.lt.s32.totalorder %s14_s7, %s14_s7 }
   0xb   :  { %p40_p5 = scmp.ne.s32.totalorder %s14_s7, %s39_s18  ;;  %p45_p7 = scmp.lt.s32.totalorder %s39_s18, %s39_s18 }
   0xd   :  { %p46_p8 = por %p45_p7, %p44_p6 }
   0xf   :  { %p47_p9 = pnand %p46_p8, %p40_p5 }
  0x11   :  { %50 = shalt.err (!%p47_p9)
}
  0x12   :  { %16 = dma.hbm_to_vmem [thread:$0]  %s82_s0, 128, %s14_s7, [#allocation3]  }
  0x13   :  { %51 = dma.done.wait [#allocation3], 128  }
  0x14   :  { %52 = vsyncadd [#allocation3], 4294967168  ;;  %vm21_vm0 = vcmask 7168   ;;  %v20_v0 = vld [vmem:[#allocation2] sm:$0xff] }
  0x15   :  { %22 = vst.msk [vmem:[%s83_s1] sm:$0xff] %vm21_vm0, %v20_v0 }
  0x16   :  { %27 = vsyncpa [#allocation3], 1 }

</bundles_post_ra>
